<compile_context>
chip_gen: v6e
topology: v6e:2x2x1
jax: 0.10.0
libtpu: 0.0.40
codegen_flags: <defaults>
</compile_context>

<pallas_src>
import functools
import math

import jax
import jax.numpy as jnp
from jax.experimental import pallas as pl
from jax.experimental.pallas import tpu as pltpu


def _cdiv(a: int, b: int) -> int:
    return -(-a // b)


def _round_up(a: int, b: int) -> int:
    return _cdiv(a, b) * b


def _one_hot_packed_kernel(t_ref, cls_ref, r_ref, o_ref):
    """(tile_r, pack) int32 targets -> (tile_r, pack*C) one-hot (lane-dense)."""
    # Replicate each of the `pack` targets across its C lanes with one bf16 MXU
    # pass against the constant 0/1 matrix R (R[s, l] = 1 iff l // C == s).
    # Exact: targets < 256 and R in {0, 1}, accumulation in f32.
    t_rep = jnp.dot(t_ref[...].astype(jnp.bfloat16), r_ref[...],
                    preferred_element_type=jnp.float32)
    # cls_ref is the precomputed (1, width) f32 row `l % C`; compare + select.
    o_ref[...] = (t_rep == cls_ref[...]).astype(o_ref.dtype)
    # NOTE: out-of-range targets (t < 0 or t >= C) give an all-zero row, whereas
    # PyTorch's F.one_hot raises a runtime error.
    # TODO(synk): no clean in-kernel equivalent of F.one_hot's range check.


def _one_hot_unpacked_kernel(t_ref, cls_ref, o_ref):
    """(tile_r, 1) int32 targets vs resident (1, C) int32 class row."""
    o_ref[...] = (t_ref[...] == cls_ref[...]).astype(o_ref.dtype)


@functools.partial(jax.jit,
                   static_argnames=("num_classes", "block_bytes", "out_dtype"))
def one_hot_encoder(target: jax.Array, num_classes: int,
                    block_bytes: int = 8 * 1024 * 1024,
                    out_dtype=jnp.float32) -> jax.Array:
    """Pallas equivalent of OneHotEncoder(labels=num_classes)(target)."""
    assert num_classes >= 1
    orig_shape = target.shape
    flat = target.reshape(-1).astype(jnp.int32)
    m = flat.shape[0]
    c = num_classes

    # ---- packing decision --------------------------------------------------
    pack = 128 // math.gcd(c, 128)        # smallest pack with pack*C % 128 == 0
    width = pack * c
    misaligned = (m % pack) != 0
    unpacked_density = c / _round_up(c, 128)
    use_packed = (
        pack > 1
        and c <= 256                       # single bf16 MXU pass stays exact
        and pack * width * 2 <= (2 << 20)  # bf16 R <= 2 MiB resident
        and width <= (1 << 16)
        # Misaligned m forces a post-kernel [:m] slice (an extra HBM pass of the
        # output); not worth it when C is already reasonably lane-dense.
        and not (misaligned and unpacked_density >= 0.65)
    )
    if not use_packed:
        pack, width = 1, c

    rows = _cdiv(m, pack)
    padded = rows * pack != m
    if padded:
        # Cheap: pads only the small int32 input; padded rows are sliced away.
        flat = jnp.pad(flat, (0, rows * pack - m))
    t2 = flat.reshape(rows, pack)

    # ---- tiling --------------------------------------------------------------
    # ~block_bytes of (input + output) bytes per grid step, multiple of 8
    # sublanes; never bigger than the (padded-to-8) row count.
    tile_r = max(8, (block_bytes // (4 * (width + pack))) // 8 * 8)
    tile_r = min(tile_r, _round_up(rows, 8))
    grid_n = _cdiv(rows, tile_r)
    if grid_n > 1 and grid_n % 2 == 1:
        # Already multi-step: round to an even step count so v7x's two
        # TensorCores stay balanced (an odd grid gives a 2:1 imbalance).  No
        # forced split of single-step problems (pure overhead on v5e/v6e).
        tile_r = max(8, _round_up(_cdiv(rows, grid_n + 1), 8))
        grid_n = _cdiv(rows, tile_r)

    # ---- resident constants (hoisted out of the kernel body) ---------------
    lane = jnp.arange(width, dtype=jnp.int32)
    if use_packed:
        cls = (lane % c).astype(jnp.float32).reshape(1, width)
        rmat = ((lane[None, :] // c)
                == jnp.arange(pack, dtype=jnp.int32)[:, None]).astype(jnp.bfloat16)
        kernel = _one_hot_packed_kernel
        operands = (t2, cls, rmat)
        in_specs = [
            pl.BlockSpec((tile_r, pack), lambda i: (i, 0)),
            pl.BlockSpec((1, width), lambda i: (0, 0)),      # resident cls row
            pl.BlockSpec((pack, width), lambda i: (0, 0)),   # resident bf16 R
        ]
    else:
        cls = lane.reshape(1, width)                          # int32 class row
        kernel = _one_hot_unpacked_kernel
        operands = (t2, cls)
        in_specs = [
            pl.BlockSpec((tile_r, pack), lambda i: (i, 0)),
            pl.BlockSpec((1, width), lambda i: (0, 0)),
        ]

    out = pl.pallas_call(
        kernel,
        out_shape=jax.ShapeDtypeStruct((rows, width), out_dtype),
        grid_spec=pltpu.PrefetchScalarGridSpec(
            num_scalar_prefetch=0,
            grid=(grid_n,),
            in_specs=in_specs,
            out_specs=pl.BlockSpec((tile_r, width), lambda i: (i, 0)),
        ),
        compiler_params=pltpu.CompilerParams(
            dimension_semantics=("parallel",),
            vmem_limit_bytes=32 * 1024 * 1024,
        ),
    )(*operands)

    # (rows, pack*C) row-major == (rows*pack, C) row-major -> contiguous reshape.
    if padded:
        out = out.reshape(rows * pack, c)[:m]
    return out.reshape(*orig_shape, c)


if __name__ == "__main__":
    key = jax.random.PRNGKey(0)

    # Packed path: small C (10 classes), per-pixel segmentation-style targets.
    num_classes = 10
    target = jax.random.randint(key, (2, 16, 16), minval=0, maxval=num_classes,
                                dtype=jnp.int32)
    result = jax.block_until_ready(one_hot_encoder(target, num_classes))
    ref = jax.nn.one_hot(target, num_classes, dtype=jnp.float32)
    assert result.shape == (2, 16, 16, num_classes), result.shape
    assert result.dtype == jnp.float32
    assert jnp.array_equal(result, ref), "mismatch vs reference one-hot (packed)"

    # Unpacked path: lane-dense C (256 classes).
    num_classes2 = 256
    target2 = jax.random.randint(jax.random.PRNGKey(1), (2, 8, 8), minval=0,
                                 maxval=num_classes2, dtype=jnp.int32)
    result2 = jax.block_until_ready(one_hot_encoder(target2, num_classes2))
    ref2 = jax.nn.one_hot(target2, num_classes2, dtype=jnp.float32)
    assert result2.shape == (2, 8, 8, num_classes2), result2.shape
    assert jnp.array_equal(result2, ref2), "mismatch vs reference one-hot (unpacked)"

    print("KERNEL_OK")
</pallas_src>

<mosaic_0001>
module attributes {stable_mosaic.version = 11 : i64} {
  func.func @_one_hot_packed_kernel(%arg0: i32, %arg1: memref<8x64xi32, #tpu.memory_space<vmem>>, %arg2: memref<1x640xf32, #tpu.memory_space<vmem>>, %arg3: memref<64x640xbf16, #tpu.memory_space<vmem>>, %arg4: memref<8x640xf32, #tpu.memory_space<vmem>>) attributes {dimension_semantics = [#tpu.dimension_semantics<parallel>], iteration_bounds = array<i64: 1>, scalar_prefetch = 0 : i64, scratch_operands = 0 : i64, tpu.core_type = #tpu.core_type<tc>, window_params = [{transform_indices = @transform_0, window_bounds = array<i64: 8, 64>}, {pipeline_mode = #tpu.pipeline_mode<synchronous>, transform_indices = @transform_1, window_bounds = array<i64: 1, 640>}, {pipeline_mode = #tpu.pipeline_mode<synchronous>, transform_indices = @transform_2, window_bounds = array<i64: 64, 640>}, {transform_indices = @transform_3, window_bounds = array<i64: 8, 640>}]} {
    %c0 = arith.constant 0 : index
    %c0_0 = arith.constant 0 : index
    %0 = vector.load %arg1[%c0, %c0_0] : memref<8x64xi32, #tpu.memory_space<vmem>>, vector<8x64xi32>
    %1 = arith.sitofp %0 : vector<8x64xi32> to vector<8x64xbf16>
    %c0_1 = arith.constant 0 : index
    %c0_2 = arith.constant 0 : index
    %2 = vector.load %arg3[%c0_1, %c0_2] : memref<64x640xbf16, #tpu.memory_space<vmem>>, vector<64x640xbf16>
    %cst = arith.constant dense<0.000000e+00> : vector<8x640xf32>
    %3 = tpu.matmul %1, %2, %cst {dimension_numbers = #tpu.dot_dimension_numbers<[1], [0], [0], [1], [0, 0, 1, 1], [], []>} : vector<8x64xbf16>, vector<64x640xbf16>, vector<8x640xf32> -> vector<8x640xf32>
    %c0_3 = arith.constant 0 : index
    %c0_4 = arith.constant 0 : index
    %4 = vector.load %arg2[%c0_3, %c0_4] : memref<1x640xf32, #tpu.memory_space<vmem>>, vector<1x640xf32>
    %5 = vector.broadcast %4 : vector<1x640xf32> to vector<8x640xf32>
    %6 = arith.cmpf oeq, %3, %5 : vector<8x640xf32>
    %7 = arith.extui %6 : vector<8x640xi1> to vector<8x640xi32>
    %8 = arith.sitofp %7 : vector<8x640xi32> to vector<8x640xf32>
    %c0_5 = arith.constant 0 : index
    %c0_6 = arith.constant 0 : index
    %9 = vector.load %arg4[%c0_5, %c0_6] : memref<8x640xf32, #tpu.memory_space<vmem>>, vector<8x640xf32>
    tpu.vector_store %arg4[%c0_5, %c0_6], %8 {strides = array<i32>} : memref<8x640xf32, #tpu.memory_space<vmem>>, vector<8x640xf32>,
    return
  }
  func.func @transform_0(%arg0: i32) -> (i32, i32) {
    %c0_i32 = arith.constant 0 : i32
    %c0_i32_0 = arith.constant 0 : i32
    return %arg0, %c0_i32 : i32, i32
  }
  func.func @transform_1(%arg0: i32) -> (i32, i32) {
    %c0_i32 = arith.constant 0 : i32
    %c0_i32_0 = arith.constant 0 : i32
    %c0_i32_1 = arith.constant 0 : i32
    return %c0_i32, %c0_i32_0 : i32, i32
  }
  func.func @transform_2(%arg0: i32) -> (i32, i32) {
    %c0_i32 = arith.constant 0 : i32
    %c0_i32_0 = arith.constant 0 : i32
    %c0_i32_1 = arith.constant 0 : i32
    return %c0_i32, %c0_i32_0 : i32, i32
  }
  func.func @transform_3(%arg0: i32) -> (i32, i32) {
    %c0_i32 = arith.constant 0 : i32
    %c0_i32_0 = arith.constant 0 : i32
    return %arg0, %c0_i32 : i32, i32
  }
}

</mosaic_0001>

<bundles_post_ra>
// kernel: one_hot_encoder.1
= control target key start
LH: loop header
LB: loop body
LE: loop exit
PB: predicated region body
PF: predicated region fallthrough
CT: control target
= control target key end

     0   :  { %v399_v1 = vmov 0   ;;  %vm146_vm0 = vcmask 523264   ;;  %v400_v21 = vmov 0.0   ;;  %vm401_vm1 = vmmov 0   ;;  %s506_s2 = inlined_call_operand.vmem [shape: bf16[64,640], index: 2, kind: input, shape index: {}]   ;;  %s507_s0 = inlined_call_operand.vmem [shape: s32[8,64], index: 0, kind: input, shape index: {}]   ;;  %s508_s1 = inlined_call_operand.vmem [shape: f32[1,640], index: 1, kind: input, shape index: {}]   ;;  %s509_s3 = inlined_call_operand.vmem [shape: f32[8,640], index: 3, kind: output, shape index: {}]  }
   0x1   :  { %v371_v0 = vld [vmem:[%s506_s2 + $0x7c] ss:$20 sps:$4 sm:$0xff]   ;;  %182 = vmatprep.mubr.bf16.mxu0 %v399_v1  ;;  %223 = vmatprep.mubr.bf16.mxu1 %v399_v1  ;;  %v373_v2 = vld [vmem:[%s506_s2 + $0x78] ss:$20 sps:$4 sm:$0xff]   ;;  %v374_v3 = vld [vmem:[%s506_s2 + $0x54] ss:$20 sps:$4 sm:$0xff]   ;;  %v274_v25 = vlaneseq }
   0x2   :  { %158 = vmatprep.subr.bf16.mxu0 %v371_v0  ;;  %v376_v4 = vld [vmem:[%s506_s2 + $0x50] ss:$20 sps:$4 sm:$0xff]   ;;  %v377_v5 = vld [vmem:[%s506_s2 + $0x2c] ss:$20 sps:$4 sm:$0xff]   ;;  %v379_v8 = vld [vmem:[%s506_s2 + $0x28] ss:$20 sps:$4 sm:$0xff]  }
   0x3   :  { %159 = vmatpush1.bf16.msra.mxu0 %v373_v2  ;;  %v380_v6 = vld [vmem:[%s506_s2 + $0x84] ss:$20 sps:$4 sm:$0xff]   ;;  %v382_v7 = vld [vmem:[%s506_s2 + $0x80] ss:$20 sps:$4 sm:$0xff]   ;;  %v386_v10 = vld [vmem:[%s506_s2 + $0x5c] ss:$20 sps:$4 sm:$0xff]  }
   0x4   :  { %160 = vmatprep.subr.bf16.mxu0 %v374_v3  ;;  %199 = vmatprep.subr.bf16.mxu1 %v380_v6  ;;  %v383_v9 = vld [vmem:[%s506_s2 + $0x4] ss:$20 sps:$4 sm:$0xff]   ;;  %v385_v13 = vld [vmem:[%s506_s2] ss:$20 sps:$4 sm:$0xff]   ;;  %v389_v19 = vld [vmem:[%s506_s2 + $0x88] ss:$20 sps:$4 sm:$0xff]  }
   0x5   :  { %200 = vmatpush1.bf16.msra.mxu1 %v382_v7  ;;  %v388_v11 = vld [vmem:[%s506_s2 + $0x58] ss:$20 sps:$4 sm:$0xff]   ;;  %v15_v12 = vld [vmem:[%s507_s0] sm:$0xff]  ;;  %v390_v15 = vld [vmem:[%s506_s2 + $0x34] ss:$20 sps:$4 sm:$0xff]   ;;  %v275_v26 = vshrl.u32 %v274_v25, 7 }
   0x6   :  { %201 = vmatprep.subr.bf16.mxu1 %v386_v10  ;;  %v16_v14 = vcvt.s32.f32 %v15_v12  ;;  %v392_v16 = vld [vmem:[%s506_s2 + $0x30] ss:$20 sps:$4 sm:$0xff]   ;;  %v394_v17 = vld [vmem:[%s506_s2 + $0xc] ss:$20 sps:$4 sm:$0xff]   ;;  %v396_v20 = vld [vmem:[%s506_s2 + $0x8] ss:$20 sps:$4 sm:$0xff]  }
   0x7   :  { %161 = vmatpush1.bf16.msra.mxu0 %v376_v4  ;;  %v393_v22 = vld [vmem:[%s506_s2 + $0x60] ss:$20 sps:$4 sm:$0xff]   ;;  %v397_v23 = vld [vmem:[%s506_s2 + $0x38] ss:$20 sps:$4 sm:$0xff]   ;;  %v398_v24 = vld [vmem:[%s506_s2 + $0x10] ss:$20 sps:$4 sm:$0xff]  }
   0x8   :  { %162 = vmatprep.subr.bf16.mxu0 %v377_v5  ;;  %v17_v18 = vpack.c.bf16 %v16_v14, %v16_v14  ;;  %v276_v27 = vsub.s32 0, %v275_v26  ;;  %v272_v28 = vld [vmem:[%s508_s1] sm:$0x1f]  ;;  %v280_v29 = vsub.s32 1, %v275_v26  ;;  %v284_v31 = vsub.s32 2, %v275_v26 }
   0x9   :  { %202 = vmatpush1.bf16.msra.mxu1 %v388_v11  ;;  %v288_v33 = vsub.s32 3, %v275_v26  ;;  %v292_v47 = vsub.s32 4, %v275_v26 }
   0xa   :  { %203 = vmatprep.subr.bf16.mxu1 %v390_v15  ;;  %v277_v30 = vrot.slane %v272_v28, %v276_v27  ;;  %v281_v32 = vrot.slane %v272_v28, %v280_v29  ;;  %v285_v35 = vrot.slane %v272_v28, %v284_v31 }
   0xb   :  { %163 = vmatpush1.bf16.msra.mxu0 %v379_v8  ;;  %v289_v38 = vrot.slane %v272_v28, %v288_v33  ;;  %v293_v49 = vrot.slane %v272_v28, %v292_v47 }
   0xc   :  { %164 = vmatprep.subr.bf16.mxu0 %v383_v9 }
   0xd   :  { %204 = vmatpush1.bf16.msra.mxu1 %v392_v16 }
   0xe   :  { %205 = vmatprep.subr.bf16.mxu1 %v394_v17 }
   0xf   :  { %165 = vmatpush1.bf16.msra.mxu0 %v385_v13 }
  0x10   :  { %356 = vmatprep.subr.bf16.mxu0 %v400_v21 }
  0x11   :  { %206 = vmatpush1.bf16.msra.mxu1 %v396_v20 }
  0x12   :  { %343 = vmatmul.mubr.msk.bf16.vlgmr.msra.gmra.mxu0 %vm146_vm0, %v17_v18 }
  0x13   :  { %357 = vmatpush3.bf16.msra.mxu0 %v389_v19  ;;  %364 = vmatprep.mubr.msk.bf16.mxu0 %vm401_vm1, %v400_v21 }
  0x14   :  { %358 = vmatprep.subr.bf16.mxu0 %v400_v21  ;;  %344 = vmatmul.mubr.msk.bf16.vlgmr.msra.gmra.mxu1 %vm146_vm0, %v17_v18 }
  0x17   :  { %359 = vmatpush3.bf16.msra.mxu0 %v393_v22 }
  0x18   :  { %360 = vmatprep.subr.bf16.mxu0 %v400_v21 }
  0x1b   :  { %361 = vmatpush3.bf16.msra.mxu0 %v397_v23 }
  0x1c   :  { %362 = vmatprep.subr.bf16.mxu0 %v400_v21 }
  0x1f   :  { %363 = vmatpush3.bf16.msra.mxu0 %v398_v24 }
  0x22   :  { %365 = vmatmul.mubr.msk.bf16.vlgmr.msra.gmra.mxu0 %vm146_vm0, %v17_v18 }
  0xd2   :  { %v184_v34 = vpop.f32.mrf.mxu0 }
  0xd3   :  { %vm299_vm2 = vcmp.eq.f32.partialorder %v184_v34, %v277_v30 }
  0xd4   :  { %v346_v36 = vsel %vm299_vm2, 1.0, %v400_v21  ;;  %v186_v37 = vpop.f32.mrf.mxu0  ;;  %v225_v41 = vpop.f32.mrf.mxu1 }
  0xd5   :  { %314 = vst [vmem:[%s509_s3] sm:$0xff] %v346_v36  ;;  %vm300_vm3 = vcmp.eq.f32.partialorder %v186_v37, %v281_v32  ;;  %vm301_vm4 = vcmp.eq.f32.partialorder %v225_v41, %v285_v35 }
  0xd6   :  { %v347_v39 = vsel %vm300_vm3, 1.0, %v400_v21  ;;  %v188_v40 = vpop.f32.mrf.mxu0  ;;  %v348_v43 = vsel %vm301_vm4, 1.0, %v400_v21  ;;  %v227_v44 = vpop.f32.mrf.mxu1 }
  0xd7   :  { %315 = vst [vmem:[%s509_s3 + $0x8] sm:$0xff] %v347_v39  ;;  %316 = vst [vmem:[%s509_s3 + $0x10] sm:$0xff] %v348_v43  ;;  %vm302_vm5 = vcmp.eq.f32.partialorder %v227_v44, %v289_v38 }
  0xd8   :  { %v189_v42 = vpop.f32.mrf.mxu0  ;;  %v349_v45 = vsel %vm302_vm5, 1.0, %v400_v21  ;;  %v229_v46 = vpop.f32.mrf.mxu1 }
  0xd9   :  { %317 = vst [vmem:[%s509_s3 + $0x18] sm:$0xff] %v349_v45 }
  0xda   :  { %v230_v48 = vpop.f32.mrf.mxu1 }
  0xe2   :  { %v266_v50 = vpop.f32.mrf.mxu0 }
  0xe3   :  { %vm303_vm6 = vcmp.eq.f32.partialorder %v266_v50, %v293_v49 }
  0xe4   :  { %v350_v51 = vsel %vm303_vm6, 1.0, %v400_v21  ;;  %v366_v52 = vpop.f32.mrf.mxu0 }
  0xe5   :  { %318 = vst [vmem:[%s509_s3 + $0x20] sm:$0xff] %v350_v51 }
  0xe6   :  { %v269_v53 = vpop.f32.mrf.mxu0 }
  0xe8   :  { %v367_v54 = vpop.f32.mrf.mxu0 }

</bundles_post_ra>
